<compile_context>
chip_gen: v7x
topology: tpu7x:2x2x1
jax: 0.10.0
libtpu: 0.0.40
codegen_flags: <defaults>
</compile_context>

<pallas_src>
import functools

import jax
import jax.numpy as jnp
from jax.experimental import pallas as pl
from jax.experimental.pallas import tpu as pltpu


def _round_up(x, m):
    return ((x + m - 1) // m) * m


# --------------------------------------------------------------------------
# Pallas kernel
# --------------------------------------------------------------------------
def _dnn_kernel(n_hidden, max_len, out_pad, dims,
                ids_ref, viota_ref, t1_ref, *rest):
    """Fused DNN forward for one batch block.

    refs:
      ids_ref   : [TB, L]        int32   token ids for this batch block (streamed)
      viota_ref : [1, V]         int32   vocab iota (resident)
      t1_ref    : [L, V, H1]     f32     fused (embedding x fc1) table (resident)
      rest      : hidden_w[0..n_hidden-1] (resident), W_out (resident),
                  bias_pack (resident), out_ref ([TB, 2*out_pad], streamed)
    """
    hidden_refs = rest[:n_hidden]
    wout_ref = rest[n_hidden]
    bias_ref = rest[n_hidden + 1]
    out_ref = rest[n_hidden + 2]

    viota = viota_ref[...]                                   # [1, V]

    # Embedding gather fused with fc1: per sequence position, build a one-hot
    # [TB, V] on the VPU and contract against t1[l] on the MXU, accumulating
    # the fc1 pre-activation.  No [B, L*V] index blowup anywhere.
    h = None
    for l in range(max_len):
        idv = ids_ref[:, l:l + 1]                            # [TB, 1]
        oh = (idv == viota).astype(jnp.float32)              # [TB, V]
        contrib = jnp.dot(oh, t1_ref[l], preferred_element_type=jnp.float32)
        h = contrib if h is None else h + contrib

    # fc1 bias + ReLU (bn1 is folded into the next linear layer).
    h = jnp.maximum(h + bias_ref[0:1, :dims[0]], 0.0)

    # Hidden stack: relu(linear(h)); dropout = identity (eval mode).
    for i in range(n_hidden):
        h = jnp.dot(h, hidden_refs[i][...], preferred_element_type=jnp.float32)
        h = jnp.maximum(h + bias_ref[i + 1:i + 2, :dims[i + 1]], 0.0)

    # Single fused output matmul: [ att | bn2(fc2) ].
    fused = jnp.dot(h, wout_ref[...], preferred_element_type=jnp.float32)
    a = fused[:, :out_pad] + bias_ref[n_hidden + 1:n_hidden + 2, :out_pad]
    y = fused[:, out_pad:] + bias_ref[n_hidden + 2:n_hidden + 3, :out_pad]

    # Stable log_softmax over the (padded) class axis.  Padding lanes of y hold
    # -1e30 (from the packed bias), so exp underflows to 0 and they are ignored.
    m = jnp.max(y, axis=1, keepdims=True)
    z = y - m
    lse = jnp.log(jnp.sum(jnp.exp(z), axis=1, keepdims=True))

    out_ref[:, :out_pad] = a
    out_ref[:, out_pad:] = z - lse


# --------------------------------------------------------------------------
# One-time parameter preparation (BN folds, head fusion, packing)
# --------------------------------------------------------------------------
def prepare_params(params, *, vocab, emb_dim, max_len, out_dim):
    eps = 1e-5
    f32 = jnp.float32

    emb = params["emb"].astype(f32)
    w1 = params["w1"].astype(f32)
    b1 = params["b1"].astype(f32)

    bn1_scale = params["bn1_gamma"] / jnp.sqrt(params["bn1_var"] + eps)
    bn1_shift = params["bn1_beta"] - params["bn1_mean"] * bn1_scale
    bn2_scale = params["bn2_gamma"] / jnp.sqrt(params["bn2_var"] + eps)
    bn2_shift = params["bn2_beta"] - params["bn2_mean"] * bn2_scale

    hidden_w = [w.astype(f32) for w in params["hidden_w"]]
    hidden_b = [b.astype(f32) for b in params["hidden_b"]]
    w2 = params["w2"].astype(f32)
    b2 = params["b2"].astype(f32)
    wa = params["wa"].astype(f32)
    ba = params["ba"].astype(f32)

    # Fold bn2 into fc2 (y-head).
    w2f = w2 * bn2_scale[None, :]
    b2f = b2 * bn2_scale + bn2_shift

    # Fold bn1 (affine applied AFTER relu(fc1)) into the next linear layer.
    if hidden_w:
        hidden_b[0] = hidden_b[0] + bn1_shift @ hidden_w[0]
        hidden_w[0] = hidden_w[0] * bn1_scale[:, None]
    else:
        b2f = b2f + bn1_shift @ w2f
        w2f = w2f * bn1_scale[:, None]
        ba = ba + bn1_shift @ wa
        wa = wa * bn1_scale[:, None]

    # Fuse embedding into fc1: t1[l, v, :] = emb[v, :] @ w1[l*E:(l+1)*E, :].
    # Kept at NATURAL widths (no 128 lane padding) and in f32 for exact parity.
    h1 = w1.shape[1]
    w1_3d = w1.reshape(max_len, emb_dim, h1)
    t1 = jnp.einsum("ve,leh->lvh", emb, w1_3d)               # [L, V, H1]

    # Scaling guard: the resident working set must fit the scoped VMEM limit
    # (v7x: 64 MiB/TC physical, 32 MiB default scoped).  For larger vocab,
    # tile the L/V axis with an accumulator instead of going fully resident.
    t1_bytes = max_len * vocab * h1 * 4
    assert t1_bytes < 20 * 1024 * 1024, (
        "t1 too large for the fully-resident design; tile the LV axis.")

    dims = [h1] + [w.shape[1] for w in hidden_w]
    out_pad = _round_up(out_dim, 128)
    padw = max(dims + [out_pad])

    h_last = dims[-1]
    w_out = jnp.zeros((h_last, 2 * out_pad), f32)
    w_out = w_out.at[:, :out_dim].set(wa)
    w_out = w_out.at[:, out_pad:out_pad + out_dim].set(w2f)

    def row(v, fill=0.0):
        return jnp.full((padw,), fill, f32).at[: v.shape[0]].set(v)

    bias_rows = [row(b1)]
    bias_rows += [row(b) for b in hidden_b]
    bias_rows += [row(ba),                 # a-head bias (pad 0; sliced away)
                  row(b2f, fill=-1e30)]    # y-head bias (pad -1e30 -> ignored by softmax)
    bias_pack = jnp.stack(bias_rows, axis=0)

    v_iota = jnp.arange(vocab, dtype=jnp.int32).reshape(1, vocab)

    return {
        "v_iota": v_iota,
        "t1": t1,
        "hidden_w": hidden_w,
        "w_out": w_out,
        "bias_pack": bias_pack,
    }


# --------------------------------------------------------------------------
# Per-call wrapper
# --------------------------------------------------------------------------
def dnn_forward(token_ids, prep, *, out_dim, block_b=128):
    """token_ids: [B, max_len, 1] int32.  Returns (a, log_softmax(y))."""
    B, L, _ = token_ids.shape
    n_hidden = len(prep["hidden_w"])
    out_pad = prep["w_out"].shape[1] // 2
    max_len, vocab, h1 = prep["t1"].shape
    dims = (h1,) + tuple(w.shape[1] for w in prep["hidden_w"])

    # Batch blocking: 128-row blocks (fills the MXU M dim on all generations);
    # small batches collapse to a single 8-row-aligned block.
    tb = block_b if B >= block_b else _round_up(B, 8)
    b_pad = _round_up(B, tb)
    grid = (b_pad // tb,)

    ids = token_ids[..., 0].astype(jnp.int32)                # [B, L]
    ids = jnp.pad(ids, ((0, b_pad - B), (0, 0)))             # [B_pad, L]

    const2 = lambda b: (0, 0)
    in_specs = [
        pl.BlockSpec((tb, L), lambda b: (b, 0)),             # ids: streamed
        pl.BlockSpec((1, vocab), const2),                    # vocab iota: resident
        pl.BlockSpec((max_len, vocab, h1), lambda b: (0, 0, 0)),  # t1: resident
    ]
    in_specs += [pl.BlockSpec(w.shape, const2) for w in prep["hidden_w"]]
    in_specs += [pl.BlockSpec(prep["w_out"].shape, const2),
                 pl.BlockSpec(prep["bias_pack"].shape, const2)]

    inputs = [ids, prep["v_iota"], prep["t1"], *prep["hidden_w"],
              prep["w_out"], prep["bias_pack"]]

    slab = pl.pallas_call(
        functools.partial(_dnn_kernel, n_hidden, max_len, out_pad, dims),
        out_shape=jax.ShapeDtypeStruct((b_pad, 2 * out_pad), jnp.float32),
        grid=grid,
        in_specs=in_specs,
        out_specs=pl.BlockSpec((tb, 2 * out_pad), lambda b: (b, 0)),
        compiler_params=pltpu.CompilerParams(
            dimension_semantics=("parallel",)),   # v7x: split batch blocks over both TCs
    )(*inputs)

    a = slab[:B, :out_dim]
    logp = slab[:B, out_pad:out_pad + out_dim]
    return a, logp


# --------------------------------------------------------------------------
# Deterministic parameter construction + pure-JAX reference check
# --------------------------------------------------------------------------
def make_params(key, *, vocab, emb_dim, max_len, hidden_dims, output_dim):
    ks = list(jax.random.split(key, 16))
    k = iter(ks)

    def init(shape, scale=0.05):
        return (scale * jax.random.normal(next(k), shape)).astype(jnp.float32)

    d_in = emb_dim * max_len
    params = {
        "emb": init((vocab, emb_dim), 0.1),
        "w1": init((d_in, hidden_dims[0])),
        "b1": init((hidden_dims[0],)),
        "bn1_gamma": jnp.ones((hidden_dims[0],), jnp.float32),
        "bn1_beta": jnp.zeros((hidden_dims[0],), jnp.float32),
        "bn1_mean": 0.01 * jnp.arange(hidden_dims[0], dtype=jnp.float32),
        "bn1_var": jnp.ones((hidden_dims[0],), jnp.float32) * 1.5,
        "hidden_w": [init((hidden_dims[i], hidden_dims[i + 1]))
                     for i in range(len(hidden_dims) - 1)],
        "hidden_b": [init((hidden_dims[i + 1],))
                     for i in range(len(hidden_dims) - 1)],
        "w2": init((hidden_dims[-1], output_dim)),
        "b2": init((output_dim,)),
        "bn2_gamma": jnp.ones((output_dim,), jnp.float32),
        "bn2_beta": jnp.zeros((output_dim,), jnp.float32),
        "bn2_mean": 0.02 * jnp.arange(output_dim, dtype=jnp.float32),
        "bn2_var": jnp.ones((output_dim,), jnp.float32) * 0.8,
        "wa": init((hidden_dims[-1], output_dim)),
        "ba": init((output_dim,)),
    }
    return params


def reference_forward(token_ids, params):
    B = token_ids.shape[0]
    eps = 1e-5
    x = jnp.take(params["emb"], token_ids[..., 0], axis=0).reshape(B, -1)
    h = jnp.maximum(x @ params["w1"] + params["b1"], 0.0)
    h = (h - params["bn1_mean"]) / jnp.sqrt(params["bn1_var"] + eps) \
        * params["bn1_gamma"] + params["bn1_beta"]
    for wh, bh in zip(params["hidden_w"], params["hidden_b"]):
        h = jnp.maximum(h @ wh + bh, 0.0)
    y = h @ params["w2"] + params["b2"]
    y = (y - params["bn2_mean"]) / jnp.sqrt(params["bn2_var"] + eps) \
        * params["bn2_gamma"] + params["bn2_beta"]
    a = h @ params["wa"] + params["ba"]
    return a, jax.nn.log_softmax(y, axis=1)


if __name__ == "__main__":
    # Small, module-consistent shapes.
    VOCAB = 50
    EMB_DIM = 8
    MAX_LEN = 16
    HIDDEN_DIMS = [64, 32]
    OUTPUT_DIM = 20

    key = jax.random.PRNGKey(0)
    pkey, xkey = jax.random.split(key)
    params = make_params(pkey, vocab=VOCAB, emb_dim=EMB_DIM, max_len=MAX_LEN,
                         hidden_dims=HIDDEN_DIMS, output_dim=OUTPUT_DIM)

    # One-time fold/pack of parameters, then a jitted per-call forward.
    prep = prepare_params(params, vocab=VOCAB, emb_dim=EMB_DIM,
                          max_len=MAX_LEN, out_dim=OUTPUT_DIM)
    fwd = jax.jit(functools.partial(dnn_forward, out_dim=OUTPUT_DIM, block_b=128))

    # Check a tiny batch (single 8-row block) and a multi-block batch that
    # exercises the batch grid with resident weights + padded last block.
    for B in (4, 200):
        token_ids = jax.random.randint(xkey, (B, MAX_LEN, 1), 0, VOCAB,
                                       dtype=jnp.int32)
        a, logp = fwd(token_ids, prep)
        jax.block_until_ready((a, logp))

        a_ref, logp_ref = reference_forward(token_ids, params)
        assert jnp.allclose(a, a_ref, atol=1e-4, rtol=1e-4)
        assert jnp.allclose(logp, logp_ref, atol=1e-4, rtol=1e-4)

    print("KERNEL_OK")
</pallas_src>

<mosaic_0001>
module attributes {stable_mosaic.version = 11 : i64} {
  func.func @_dnn_kernel(%arg0: i32, %arg1: memref<8x16xi32, #tpu.memory_space<vmem>>, %arg2: memref<1x50xi32, #tpu.memory_space<vmem>>, %arg3: memref<16x50x64xf32, #tpu.memory_space<vmem>>, %arg4: memref<64x32xf32, #tpu.memory_space<vmem>>, %arg5: memref<32x256xf32, #tpu.memory_space<vmem>>, %arg6: memref<4x128xf32, #tpu.memory_space<vmem>>, %arg7: memref<8x256xf32, #tpu.memory_space<vmem>>) attributes {dimension_semantics = [#tpu.dimension_semantics<parallel>], iteration_bounds = array<i64: 1>, scalar_prefetch = 0 : i64, scratch_operands = 0 : i64, tpu.core_type = #tpu.core_type<tc>, window_params = [{transform_indices = @transform_0, window_bounds = array<i64: 8, 16>}, {pipeline_mode = #tpu.pipeline_mode<synchronous>, transform_indices = @transform_1, window_bounds = array<i64: 1, 50>}, {pipeline_mode = #tpu.pipeline_mode<synchronous>, transform_indices = @transform_2, window_bounds = array<i64: 16, 50, 64>}, {pipeline_mode = #tpu.pipeline_mode<synchronous>, transform_indices = @transform_3, window_bounds = array<i64: 64, 32>}, {pipeline_mode = #tpu.pipeline_mode<synchronous>, transform_indices = @transform_4, window_bounds = array<i64: 32, 256>}, {pipeline_mode = #tpu.pipeline_mode<synchronous>, transform_indices = @transform_5, window_bounds = array<i64: 4, 128>}, {transform_indices = @transform_6, window_bounds = array<i64: 8, 256>}]} {
    %c0 = arith.constant 0 : index
    %c0_0 = arith.constant 0 : index
    %0 = vector.load %arg2[%c0, %c0_0] : memref<1x50xi32, #tpu.memory_space<vmem>>, vector<1x50xi32>
    %c0_1 = arith.constant 0 : index
    %c0_2 = arith.constant 0 : index
    %1 = vector.load %arg1[%c0_1, %c0_2] : memref<8x16xi32, #tpu.memory_space<vmem>>, vector<8x1xi32>
    %2 = vector.broadcast %1 : vector<8x1xi32> to vector<8x50xi32>
    %3 = vector.broadcast %0 : vector<1x50xi32> to vector<8x50xi32>
    %4 = arith.cmpi eq, %2, %3 : vector<8x50xi32>
    %5 = arith.extui %4 : vector<8x50xi1> to vector<8x50xi32>
    %6 = arith.sitofp %5 : vector<8x50xi32> to vector<8x50xf32>
    %c0_3 = arith.constant 0 : index
    %c0_4 = arith.constant 0 : index
    %c0_5 = arith.constant 0 : index
    %7 = vector.load %arg3[%c0_3, %c0_4, %c0_5] : memref<16x50x64xf32, #tpu.memory_space<vmem>>, vector<1x50x64xf32>
    %8 = vector.shape_cast %7 : vector<1x50x64xf32> to vector<50x64xf32>
    %cst = arith.constant dense<0.000000e+00> : vector<8x64xf32>
    %9 = tpu.matmul %6, %8, %cst {dimension_numbers = #tpu.dot_dimension_numbers<[1], [0], [0], [1], [0, 0, 1, 1], [], []>} : vector<8x50xf32>, vector<50x64xf32>, vector<8x64xf32> -> vector<8x64xf32>
    %c0_6 = arith.constant 0 : index
    %c1 = arith.constant 1 : index
    %10 = vector.load %arg1[%c0_6, %c1] : memref<8x16xi32, #tpu.memory_space<vmem>>, vector<8x1xi32>
    %11 = vector.broadcast %10 : vector<8x1xi32> to vector<8x50xi32>
    %12 = vector.broadcast %0 : vector<1x50xi32> to vector<8x50xi32>
    %13 = arith.cmpi eq, %11, %12 : vector<8x50xi32>
    %14 = arith.extui %13 : vector<8x50xi1> to vector<8x50xi32>
    %15 = arith.sitofp %14 : vector<8x50xi32> to vector<8x50xf32>
    %c1_7 = arith.constant 1 : index
    %c0_8 = arith.constant 0 : index
    %c0_9 = arith.constant 0 : index
    %16 = vector.load %arg3[%c1_7, %c0_8, %c0_9] : memref<16x50x64xf32, #tpu.memory_space<vmem>>, vector<1x50x64xf32>
    %17 = vector.shape_cast %16 : vector<1x50x64xf32> to vector<50x64xf32>
    %cst_10 = arith.constant dense<0.000000e+00> : vector<8x64xf32>
    %18 = tpu.matmul %15, %17, %cst_10 {dimension_numbers = #tpu.dot_dimension_numbers<[1], [0], [0], [1], [0, 0, 1, 1], [], []>} : vector<8x50xf32>, vector<50x64xf32>, vector<8x64xf32> -> vector<8x64xf32>
    %19 = arith.addf %9, %18 : vector<8x64xf32>
    %c0_11 = arith.constant 0 : index
    %c2 = arith.constant 2 : index
    %20 = vector.load %arg1[%c0_11, %c2] : memref<8x16xi32, #tpu.memory_space<vmem>>, vector<8x1xi32>
    %21 = vector.broadcast %20 : vector<8x1xi32> to vector<8x50xi32>
    %22 = vector.broadcast %0 : vector<1x50xi32> to vector<8x50xi32>
    %23 = arith.cmpi eq, %21, %22 : vector<8x50xi32>
    %24 = arith.extui %23 : vector<8x50xi1> to vector<8x50xi32>
    %25 = arith.sitofp %24 : vector<8x50xi32> to vector<8x50xf32>
    %c2_12 = arith.constant 2 : index
    %c0_13 = arith.constant 0 : index
    %c0_14 = arith.constant 0 : index
    %26 = vector.load %arg3[%c2_12, %c0_13, %c0_14] : memref<16x50x64xf32, #tpu.memory_space<vmem>>, vector<1x50x64xf32>
    %27 = vector.shape_cast %26 : vector<1x50x64xf32> to vector<50x64xf32>
    %cst_15 = arith.constant dense<0.000000e+00> : vector<8x64xf32>
    %28 = tpu.matmul %25, %27, %cst_15 {dimension_numbers = #tpu.dot_dimension_numbers<[1], [0], [0], [1], [0, 0, 1, 1], [], []>} : vector<8x50xf32>, vector<50x64xf32>, vector<8x64xf32> -> vector<8x64xf32>
    %29 = arith.addf %19, %28 : vector<8x64xf32>
    %c0_16 = arith.constant 0 : index
    %c3 = arith.constant 3 : index
    %30 = vector.load %arg1[%c0_16, %c3] : memref<8x16xi32, #tpu.memory_space<vmem>>, vector<8x1xi32>
    %31 = vector.broadcast %30 : vector<8x1xi32> to vector<8x50xi32>
    %32 = vector.broadcast %0 : vector<1x50xi32> to vector<8x50xi32>
    %33 = arith.cmpi eq, %31, %32 : vector<8x50xi32>
    %34 = arith.extui %33 : vector<8x50xi1> to vector<8x50xi32>
    %35 = arith.sitofp %34 : vector<8x50xi32> to vector<8x50xf32>
    %c3_17 = arith.constant 3 : index
    %c0_18 = arith.constant 0 : index
    %c0_19 = arith.constant 0 : index
    %36 = vector.load %arg3[%c3_17, %c0_18, %c0_19] : memref<16x50x64xf32, #tpu.memory_space<vmem>>, vector<1x50x64xf32>
    %37 = vector.shape_cast %36 : vector<1x50x64xf32> to vector<50x64xf32>
    %cst_20 = arith.constant dense<0.000000e+00> : vector<8x64xf32>
    %38 = tpu.matmul %35, %37, %cst_20 {dimension_numbers = #tpu.dot_dimension_numbers<[1], [0], [0], [1], [0, 0, 1, 1], [], []>} : vector<8x50xf32>, vector<50x64xf32>, vector<8x64xf32> -> vector<8x64xf32>
    %39 = arith.addf %29, %38 : vector<8x64xf32>
    %c0_21 = arith.constant 0 : index
    %c4 = arith.constant 4 : index
    %40 = vector.load %arg1[%c0_21, %c4] : memref<8x16xi32, #tpu.memory_space<vmem>>, vector<8x1xi32>
    %41 = vector.broadcast %40 : vector<8x1xi32> to vector<8x50xi32>
    %42 = vector.broadcast %0 : vector<1x50xi32> to vector<8x50xi32>
    %43 = arith.cmpi eq, %41, %42 : vector<8x50xi32>
    %44 = arith.extui %43 : vector<8x50xi1> to vector<8x50xi32>
    %45 = arith.sitofp %44 : vector<8x50xi32> to vector<8x50xf32>
    %c4_22 = arith.constant 4 : index
    %c0_23 = arith.constant 0 : index
    %c0_24 = arith.constant 0 : index
    %46 = vector.load %arg3[%c4_22, %c0_23, %c0_24] : memref<16x50x64xf32, #tpu.memory_space<vmem>>, vector<1x50x64xf32>
    %47 = vector.shape_cast %46 : vector<1x50x64xf32> to vector<50x64xf32>
    %cst_25 = arith.constant dense<0.000000e+00> : vector<8x64xf32>
    %48 = tpu.matmul %45, %47, %cst_25 {dimension_numbers = #tpu.dot_dimension_numbers<[1], [0], [0], [1], [0, 0, 1, 1], [], []>} : vector<8x50xf32>, vector<50x64xf32>, vector<8x64xf32> -> vector<8x64xf32>
    %49 = arith.addf %39, %48 : vector<8x64xf32>
    %c0_26 = arith.constant 0 : index
    %c5 = arith.constant 5 : index
    %50 = vector.load %arg1[%c0_26, %c5] : memref<8x16xi32, #tpu.memory_space<vmem>>, vector<8x1xi32>
    %51 = vector.broadcast %50 : vector<8x1xi32> to vector<8x50xi32>
    %52 = vector.broadcast %0 : vector<1x50xi32> to vector<8x50xi32>
    %53 = arith.cmpi eq, %51, %52 : vector<8x50xi32>
    %54 = arith.extui %53 : vector<8x50xi1> to vector<8x50xi32>
    %55 = arith.sitofp %54 : vector<8x50xi32> to vector<8x50xf32>
    %c5_27 = arith.constant 5 : index
    %c0_28 = arith.constant 0 : index
    %c0_29 = arith.constant 0 : index
    %56 = vector.load %arg3[%c5_27, %c0_28, %c0_29] : memref<16x50x64xf32, #tpu.memory_space<vmem>>, vector<1x50x64xf32>
    %57 = vector.shape_cast %56 : vector<1x50x64xf32> to vector<50x64xf32>
    %cst_30 = arith.constant dense<0.000000e+00> : vector<8x64xf32>
    %58 = tpu.matmul %55, %57, %cst_30 {dimension_numbers = #tpu.dot_dimension_numbers<[1], [0], [0], [1], [0, 0, 1, 1], [], []>} : vector<8x50xf32>, vector<50x64xf32>, vector<8x64xf32> -> vector<8x64xf32>
    %59 = arith.addf %49, %58 : vector<8x64xf32>
    %c0_31 = arith.constant 0 : index
    %c6 = arith.constant 6 : index
    %60 = vector.load %arg1[%c0_31, %c6] : memref<8x16xi32, #tpu.memory_space<vmem>>, vector<8x1xi32>
    %61 = vector.broadcast %60 : vector<8x1xi32> to vector<8x50xi32>
    %62 = vector.broadcast %0 : vector<1x50xi32> to vector<8x50xi32>
    %63 = arith.cmpi eq, %61, %62 : vector<8x50xi32>
    %64 = arith.extui %63 : vector<8x50xi1> to vector<8x50xi32>
    %65 = arith.sitofp %64 : vector<8x50xi32> to vector<8x50xf32>
    %c6_32 = arith.constant 6 : index
    %c0_33 = arith.constant 0 : index
    %c0_34 = arith.constant 0 : index
    %66 = vector.load %arg3[%c6_32, %c0_33, %c0_34] : memref<16x50x64xf32, #tpu.memory_space<vmem>>, vector<1x50x64xf32>
    %67 = vector.shape_cast %66 : vector<1x50x64xf32> to vector<50x64xf32>
    %cst_35 = arith.constant dense<0.000000e+00> : vector<8x64xf32>
    %68 = tpu.matmul %65, %67, %cst_35 {dimension_numbers = #tpu.dot_dimension_numbers<[1], [0], [0], [1], [0, 0, 1, 1], [], []>} : vector<8x50xf32>, vector<50x64xf32>, vector<8x64xf32> -> vector<8x64xf32>
    %69 = arith.addf %59, %68 : vector<8x64xf32>
    %c0_36 = arith.constant 0 : index
    %c7 = arith.constant 7 : index
    %70 = vector.load %arg1[%c0_36, %c7] : memref<8x16xi32, #tpu.memory_space<vmem>>, vector<8x1xi32>
    %71 = vector.broadcast %70 : vector<8x1xi32> to vector<8x50xi32>
    %72 = vector.broadcast %0 : vector<1x50xi32> to vector<8x50xi32>
    %73 = arith.cmpi eq, %71, %72 : vector<8x50xi32>
    %74 = arith.extui %73 : vector<8x50xi1> to vector<8x50xi32>
    %75 = arith.sitofp %74 : vector<8x50xi32> to vector<8x50xf32>
    %c7_37 = arith.constant 7 : index
    %c0_38 = arith.constant 0 : index
    %c0_39 = arith.constant 0 : index
    %76 = vector.load %arg3[%c7_37, %c0_38, %c0_39] : memref<16x50x64xf32, #tpu.memory_space<vmem>>, vector<1x50x64xf32>
    %77 = vector.shape_cast %76 : vector<1x50x64xf32> to vector<50x64xf32>
    %cst_40 = arith.constant dense<0.000000e+00> : vector<8x64xf32>
    %78 = tpu.matmul %75, %77, %cst_40 {dimension_numbers = #tpu.dot_dimension_numbers<[1], [0], [0], [1], [0, 0, 1, 1], [], []>} : vector<8x50xf32>, vector<50x64xf32>, vector<8x64xf32> -> vector<8x64xf32>
    %79 = arith.addf %69, %78 : vector<8x64xf32>
    %c0_41 = arith.constant 0 : index
    %c8 = arith.constant 8 : index
    %80 = vector.load %arg1[%c0_41, %c8] : memref<8x16xi32, #tpu.memory_space<vmem>>, vector<8x1xi32>
    %81 = vector.broadcast %80 : vector<8x1xi32> to vector<8x50xi32>
    %82 = vector.broadcast %0 : vector<1x50xi32> to vector<8x50xi32>
    %83 = arith.cmpi eq, %81, %82 : vector<8x50xi32>
    %84 = arith.extui %83 : vector<8x50xi1> to vector<8x50xi32>
    %85 = arith.sitofp %84 : vector<8x50xi32> to vector<8x50xf32>
    %c8_42 = arith.constant 8 : index
    %c0_43 = arith.constant 0 : index
    %c0_44 = arith.constant 0 : index
    %86 = vector.load %arg3[%c8_42, %c0_43, %c0_44] : memref<16x50x64xf32, #tpu.memory_space<vmem>>, vector<1x50x64xf32>
    %87 = vector.shape_cast %86 : vector<1x50x64xf32> to vector<50x64xf32>
    %cst_45 = arith.constant dense<0.000000e+00> : vector<8x64xf32>
    %88 = tpu.matmul %85, %87, %cst_45 {dimension_numbers = #tpu.dot_dimension_numbers<[1], [0], [0], [1], [0, 0, 1, 1], [], []>} : vector<8x50xf32>, vector<50x64xf32>, vector<8x64xf32> -> vector<8x64xf32>
    %89 = arith.addf %79, %88 : vector<8x64xf32>
    %c0_46 = arith.constant 0 : index
    %c9 = arith.constant 9 : index
    %90 = vector.load %arg1[%c0_46, %c9] : memref<8x16xi32, #tpu.memory_space<vmem>>, vector<8x1xi32>
    %91 = vector.broadcast %90 : vector<8x1xi32> to vector<8x50xi32>
    %92 = vector.broadcast %0 : vector<1x50xi32> to vector<8x50xi32>
    %93 = arith.cmpi eq, %91, %92 : vector<8x50xi32>
    %94 = arith.extui %93 : vector<8x50xi1> to vector<8x50xi32>
    %95 = arith.sitofp %94 : vector<8x50xi32> to vector<8x50xf32>
    %c9_47 = arith.constant 9 : index
    %c0_48 = arith.constant 0 : index
    %c0_49 = arith.constant 0 : index
    %96 = vector.load %arg3[%c9_47, %c0_48, %c0_49] : memref<16x50x64xf32, #tpu.memory_space<vmem>>, vector<1x50x64xf32>
    %97 = vector.shape_cast %96 : vector<1x50x64xf32> to vector<50x64xf32>
    %cst_50 = arith.constant dense<0.000000e+00> : vector<8x64xf32>
    %98 = tpu.matmul %95, %97, %cst_50 {dimension_numbers = #tpu.dot_dimension_numbers<[1], [0], [0], [1], [0, 0, 1, 1], [], []>} : vector<8x50xf32>, vector<50x64xf32>, vector<8x64xf32> -> vector<8x64xf32>
    %99 = arith.addf %89, %98 : vector<8x64xf32>
    %c0_51 = arith.constant 0 : index
    %c10 = arith.constant 10 : index
    %100 = vector.load %arg1[%c0_51, %c10] : memref<8x16xi32, #tpu.memory_space<vmem>>, vector<8x1xi32>
    %101 = vector.broadcast %100 : vector<8x1xi32> to vector<8x50xi32>
    %102 = vector.broadcast %0 : vector<1x50xi32> to vector<8x50xi32>
    %103 = arith.cmpi eq, %101, %102 : vector<8x50xi32>
    %104 = arith.extui %103 : vector<8x50xi1> to vector<8x50xi32>
    %105 = arith.sitofp %104 : vector<8x50xi32> to vector<8x50xf32>
    %c10_52 = arith.constant 10 : index
    %c0_53 = arith.constant 0 : index
    %c0_54 = arith.constant 0 : index
    %106 = vector.load %arg3[%c10_52, %c0_53, %c0_54] : memref<16x50x64xf32, #tpu.memory_space<vmem>>, vector<1x50x64xf32>
    %107 = vector.shape_cast %106 : vector<1x50x64xf32> to vector<50x64xf32>
    %cst_55 = arith.constant dense<0.000000e+00> : vector<8x64xf32>
    %108 = tpu.matmul %105, %107, %cst_55 {dimension_numbers = #tpu.dot_dimension_numbers<[1], [0], [0], [1], [0, 0, 1, 1], [], []>} : vector<8x50xf32>, vector<50x64xf32>, vector<8x64xf32> -> vector<8x64xf32>
    %109 = arith.addf %99, %108 : vector<8x64xf32>
    %c0_56 = arith.constant 0 : index
    %c11 = arith.constant 11 : index
    %110 = vector.load %arg1[%c0_56, %c11] : memref<8x16xi32, #tpu.memory_space<vmem>>, vector<8x1xi32>
    %111 = vector.broadcast %110 : vector<8x1xi32> to vector<8x50xi32>
    %112 = vector.broadcast %0 : vector<1x50xi32> to vector<8x50xi32>
    %113 = arith.cmpi eq, %111, %112 : vector<8x50xi32>
    %114 = arith.extui %113 : vector<8x50xi1> to vector<8x50xi32>
    %115 = arith.sitofp %114 : vector<8x50xi32> to vector<8x50xf32>
    %c11_57 = arith.constant 11 : index
    %c0_58 = arith.constant 0 : index
    %c0_59 = arith.constant 0 : index
    %116 = vector.load %arg3[%c11_57, %c0_58, %c0_59] : memref<16x50x64xf32, #tpu.memory_space<vmem>>, vector<1x50x64xf32>
    %117 = vector.shape_cast %116 : vector<1x50x64xf32> to vector<50x64xf32>
    %cst_60 = arith.constant dense<0.000000e+00> : vector<8x64xf32>
    %118 = tpu.matmul %115, %117, %cst_60 {dimension_numbers = #tpu.dot_dimension_numbers<[1], [0], [0], [1], [0, 0, 1, 1], [], []>} : vector<8x50xf32>, vector<50x64xf32>, vector<8x64xf32> -> vector<8x64xf32>
    %119 = arith.addf %109, %118 : vector<8x64xf32>
    %c0_61 = arith.constant 0 : index
    %c12 = arith.constant 12 : index
    %120 = vector.load %arg1[%c0_61, %c12] : memref<8x16xi32, #tpu.memory_space<vmem>>, vector<8x1xi32>
    %121 = vector.broadcast %120 : vector<8x1xi32> to vector<8x50xi32>
    %122 = vector.broadcast %0 : vector<1x50xi32> to vector<8x50xi32>
    %123 = arith.cmpi eq, %121, %122 : vector<8x50xi32>
    %124 = arith.extui %123 : vector<8x50xi1> to vector<8x50xi32>
    %125 = arith.sitofp %124 : vector<8x50xi32> to vector<8x50xf32>
    %c12_62 = arith.constant 12 : index
    %c0_63 = arith.constant 0 : index
    %c0_64 = arith.constant 0 : index
    %126 = vector.load %arg3[%c12_62, %c0_63, %c0_64] : memref<16x50x64xf32, #tpu.memory_space<vmem>>, vector<1x50x64xf32>
    %127 = vector.shape_cast %126 : vector<1x50x64xf32> to vector<50x64xf32>
    %cst_65 = arith.constant dense<0.000000e+00> : vector<8x64xf32>
    %128 = tpu.matmul %125, %127, %cst_65 {dimension_numbers = #tpu.dot_dimension_numbers<[1], [0], [0], [1], [0, 0, 1, 1], [], []>} : vector<8x50xf32>, vector<50x64xf32>, vector<8x64xf32> -> vector<8x64xf32>
    %129 = arith.addf %119, %128 : vector<8x64xf32>
    %c0_66 = arith.constant 0 : index
    %c13 = arith.constant 13 : index
    %130 = vector.load %arg1[%c0_66, %c13] : memref<8x16xi32, #tpu.memory_space<vmem>>, vector<8x1xi32>
    %131 = vector.broadcast %130 : vector<8x1xi32> to vector<8x50xi32>
    %132 = vector.broadcast %0 : vector<1x50xi32> to vector<8x50xi32>
    %133 = arith.cmpi eq, %131, %132 : vector<8x50xi32>
    %134 = arith.extui %133 : vector<8x50xi1> to vector<8x50xi32>
    %135 = arith.sitofp %134 : vector<8x50xi32> to vector<8x50xf32>
    %c13_67 = arith.constant 13 : index
    %c0_68 = arith.constant 0 : index
    %c0_69 = arith.constant 0 : index
    %136 = vector.load %arg3[%c13_67, %c0_68, %c0_69] : memref<16x50x64xf32, #tpu.memory_space<vmem>>, vector<1x50x64xf32>
    %137 = vector.shape_cast %136 : vector<1x50x64xf32> to vector<50x64xf32>
    %cst_70 = arith.constant dense<0.000000e+00> : vector<8x64xf32>
    %138 = tpu.matmul %135, %137, %cst_70 {dimension_numbers = #tpu.dot_dimension_numbers<[1], [0], [0], [1], [0, 0, 1, 1], [], []>} : vector<8x50xf32>, vector<50x64xf32>, vector<8x64xf32> -> vector<8x64xf32>
    %139 = arith.addf %129, %138 : vector<8x64xf32>
    %c0_71 = arith.constant 0 : index
    %c14 = arith.constant 14 : index
    %140 = vector.load %arg1[%c0_71, %c14] : memref<8x16xi32, #tpu.memory_space<vmem>>, vector<8x1xi32>
    %141 = vector.broadcast %140 : vector<8x1xi32> to vector<8x50xi32>
    %142 = vector.broadcast %0 : vector<1x50xi32> to vector<8x50xi32>
    %143 = arith.cmpi eq, %141, %142 : vector<8x50xi32>
    %144 = arith.extui %143 : vector<8x50xi1> to vector<8x50xi32>
    %145 = arith.sitofp %144 : vector<8x50xi32> to vector<8x50xf32>
    %c14_72 = arith.constant 14 : index
    %c0_73 = arith.constant 0 : index
    %c0_74 = arith.constant 0 : index
    %146 = vector.load %arg3[%c14_72, %c0_73, %c0_74] : memref<16x50x64xf32, #tpu.memory_space<vmem>>, vector<1x50x64xf32>
    %147 = vector.shape_cast %146 : vector<1x50x64xf32> to vector<50x64xf32>
    %cst_75 = arith.constant dense<0.000000e+00> : vector<8x64xf32>
    %148 = tpu.matmul %145, %147, %cst_75 {dimension_numbers = #tpu.dot_dimension_numbers<[1], [0], [0], [1], [0, 0, 1, 1], [], []>} : vector<8x50xf32>, vector<50x64xf32>, vector<8x64xf32> -> vector<8x64xf32>
    %149 = arith.addf %139, %148 : vector<8x64xf32>
    %c0_76 = arith.constant 0 : index
    %c15 = arith.constant 15 : index
    %150 = vector.load %arg1[%c0_76, %c15] : memref<8x16xi32, #tpu.memory_space<vmem>>, vector<8x1xi32>
    %151 = vector.broadcast %150 : vector<8x1xi32> to vector<8x50xi32>
    %152 = vector.broadcast %0 : vector<1x50xi32> to vector<8x50xi32>
    %153 = arith.cmpi eq, %151, %152 : vector<8x50xi32>
    %154 = arith.extui %153 : vector<8x50xi1> to vector<8x50xi32>
    %155 = arith.sitofp %154 : vector<8x50xi32> to vector<8x50xf32>
    %c15_77 = arith.constant 15 : index
    %c0_78 = arith.constant 0 : index
    %c0_79 = arith.constant 0 : index
    %156 = vector.load %arg3[%c15_77, %c0_78, %c0_79] : memref<16x50x64xf32, #tpu.memory_space<vmem>>, vector<1x50x64xf32>
    %157 = vector.shape_cast %156 : vector<1x50x64xf32> to vector<50x64xf32>
    %cst_80 = arith.constant dense<0.000000e+00> : vector<8x64xf32>
    %158 = tpu.matmul %155, %157, %cst_80 {dimension_numbers = #tpu.dot_dimension_numbers<[1], [0], [0], [1], [0, 0, 1, 1], [], []>} : vector<8x50xf32>, vector<50x64xf32>, vector<8x64xf32> -> vector<8x64xf32>
    %159 = arith.addf %149, %158 : vector<8x64xf32>
    %c0_81 = arith.constant 0 : index
    %c0_82 = arith.constant 0 : index
    %160 = vector.load %arg6[%c0_81, %c0_82] : memref<4x128xf32, #tpu.memory_space<vmem>>, vector<1x64xf32>
    %161 = vector.broadcast %160 : vector<1x64xf32> to vector<8x64xf32>
    %162 = arith.addf %159, %161 : vector<8x64xf32>
    %cst_83 = arith.constant 0.000000e+00 : f32
    %163 = vector.broadcast %cst_83 : f32 to vector<8x64xf32>
    %164 = arith.maximumf %162, %163 : vector<8x64xf32>
    %c0_84 = arith.constant 0 : index
    %c0_85 = arith.constant 0 : index
    %165 = vector.load %arg4[%c0_84, %c0_85] : memref<64x32xf32, #tpu.memory_space<vmem>>, vector<64x32xf32>
    %cst_86 = arith.constant dense<0.000000e+00> : vector<8x32xf32>
    %166 = tpu.matmul %164, %165, %cst_86 {dimension_numbers = #tpu.dot_dimension_numbers<[1], [0], [0], [1], [0, 0, 1, 1], [], []>} : vector<8x64xf32>, vector<64x32xf32>, vector<8x32xf32> -> vector<8x32xf32>
    %c1_87 = arith.constant 1 : index
    %c0_88 = arith.constant 0 : index
    %167 = vector.load %arg6[%c1_87, %c0_88] : memref<4x128xf32, #tpu.memory_space<vmem>>, vector<1x32xf32>
    %168 = vector.broadcast %167 : vector<1x32xf32> to vector<8x32xf32>
    %169 = arith.addf %166, %168 : vector<8x32xf32>
    %cst_89 = arith.constant 0.000000e+00 : f32
    %170 = vector.broadcast %cst_89 : f32 to vector<8x32xf32>
    %171 = arith.maximumf %169, %170 : vector<8x32xf32>
    %c0_90 = arith.constant 0 : index
    %c0_91 = arith.constant 0 : index
    %172 = vector.load %arg5[%c0_90, %c0_91] : memref<32x256xf32, #tpu.memory_space<vmem>>, vector<32x256xf32>
    %cst_92 = arith.constant dense<0.000000e+00> : vector<8x256xf32>
    %173 = tpu.matmul %171, %172, %cst_92 {dimension_numbers = #tpu.dot_dimension_numbers<[1], [0], [0], [1], [0, 0, 1, 1], [], []>} : vector<8x32xf32>, vector<32x256xf32>, vector<8x256xf32> -> vector<8x256xf32>
    %174 = vector.extract_strided_slice %173 {offsets = [0, 0], sizes = [8, 128], strides = [1, 1]} : vector<8x256xf32> to vector<8x128xf32>
    %c2_93 = arith.constant 2 : index
    %c0_94 = arith.constant 0 : index
    %175 = vector.load %arg6[%c2_93, %c0_94] : memref<4x128xf32, #tpu.memory_space<vmem>>, vector<1x128xf32>
    %176 = vector.broadcast %175 : vector<1x128xf32> to vector<8x128xf32>
    %177 = arith.addf %174, %176 : vector<8x128xf32>
    %178 = vector.extract_strided_slice %173 {offsets = [0, 128], sizes = [8, 128], strides = [1, 1]} : vector<8x256xf32> to vector<8x128xf32>
    %c3_95 = arith.constant 3 : index
    %c0_96 = arith.constant 0 : index
    %179 = vector.load %arg6[%c3_95, %c0_96] : memref<4x128xf32, #tpu.memory_space<vmem>>, vector<1x128xf32>
    %180 = vector.broadcast %179 : vector<1x128xf32> to vector<8x128xf32>
    %181 = arith.addf %178, %180 : vector<8x128xf32>
    %cst_97 = arith.constant dense<0xFF800000> : vector<8xf32>
    %182 = vector.multi_reduction <maximumf>, %181, %cst_97 [1] : vector<8x128xf32> to vector<8xf32>
    %183 = vector.shape_cast %182 : vector<8xf32> to vector<8x1xf32>
    %184 = vector.broadcast %183 : vector<8x1xf32> to vector<8x128xf32>
    %185 = arith.subf %181, %184 : vector<8x128xf32>
    %186 = math.exp %185 : vector<8x128xf32>
    %cst_98 = arith.constant dense<0.000000e+00> : vector<8xf32>
    %187 = vector.multi_reduction <add>, %186, %cst_98 [1] : vector<8x128xf32> to vector<8xf32>
    %188 = vector.shape_cast %187 : vector<8xf32> to vector<8x1xf32>
    %189 = math.log %188 : vector<8x1xf32>
    %c0_99 = arith.constant 0 : index
    %c0_100 = arith.constant 0 : index
    %190 = vector.load %arg7[%c0_99, %c0_100] : memref<8x256xf32, #tpu.memory_space<vmem>>, vector<8x128xf32>
    tpu.vector_store %arg7[%c0_99, %c0_100], %177 {strides = array<i32>} : memref<8x256xf32, #tpu.memory_space<vmem>>, vector<8x128xf32>,
    %191 = vector.broadcast %189 : vector<8x1xf32> to vector<8x128xf32>
    %192 = arith.subf %185, %191 : vector<8x128xf32>
    %c0_101 = arith.constant 0 : index
    %c128 = arith.constant 128 : index
    %193 = vector.load %arg7[%c0_101, %c128] : memref<8x256xf32, #tpu.memory_space<vmem>>, vector<8x128xf32>
    tpu.vector_store %arg7[%c0_101, %c128], %192 {strides = array<i32>} : memref<8x256xf32, #tpu.memory_space<vmem>>, vector<8x128xf32>,
    return
  }
  func.func @transform_0(%arg0: i32) -> (i32, i32) {
    %c0_i32 = arith.constant 0 : i32
    %c0_i32_0 = arith.constant 0 : i32
    return %arg0, %c0_i32 : i32, i32
  }
  func.func @transform_1(%arg0: i32) -> (i32, i32) {
    %c0_i32 = arith.constant 0 : i32
    %c0_i32_0 = arith.constant 0 : i32
    %c0_i32_1 = arith.constant 0 : i32
    return %c0_i32, %c0_i32_0 : i32, i32
  }
  func.func @transform_2(%arg0: i32) -> (i32, i32, i32) {
    %c0_i32 = arith.constant 0 : i32
    %c0_i32_0 = arith.constant 0 : i32
    %c0_i32_1 = arith.constant 0 : i32
    %c0_i32_2 = arith.constant 0 : i32
    return %c0_i32, %c0_i32_0, %c0_i32_1 : i32, i32, i32
  }
  func.func @transform_3(%arg0: i32) -> (i32, i32) {
    %c0_i32 = arith.constant 0 : i32
    %c0_i32_0 = arith.constant 0 : i32
    %c0_i32_1 = arith.constant 0 : i32
    return %c0_i32, %c0_i32_0 : i32, i32
  }
  func.func @transform_4(%arg0: i32) -> (i32, i32) {
    %c0_i32 = arith.constant 0 : i32
    %c0_i32_0 = arith.constant 0 : i32
    %c0_i32_1 = arith.constant 0 : i32
    return %c0_i32, %c0_i32_0 : i32, i32
  }
  func.func @transform_5(%arg0: i32) -> (i32, i32) {
    %c0_i32 = arith.constant 0 : i32
    %c0_i32_0 = arith.constant 0 : i32
    %c0_i32_1 = arith.constant 0 : i32
    return %c0_i32, %c0_i32_0 : i32, i32
  }
  func.func @transform_6(%arg0: i32) -> (i32, i32) {
    %c0_i32 = arith.constant 0 : i32
    %c0_i32_0 = arith.constant 0 : i32
    return %arg0, %c0_i32 : i32, i32
  }
}

</mosaic_0001>

<bundles_post_ra>
// kernel: dnn_forward.1
= control target key start
LH: loop header
LB: loop body
LE: loop exit
PB: predicated region body
PF: predicated region fallthrough
CT: control target
= control target key end

     0   :  { %v2482_v0 = vmov 1   ;;  %v2483_v2 = vmov 2   ;;  %v2484_v8 = vmov 0.0|0.0   ;;  %v2485_v11 = vmov 0   ;;  %s3131_s0 = inlined_call_operand.vmem [shape: s32[8,16], index: 0, kind: input, shape index: {}]   ;;  %s3132_s2 = inlined_call_operand.vmem [shape: f32[16,50,64], index: 2, kind: input, shape index: {}]   ;;  %s3133_s1 = inlined_call_operand.vmem [shape: s32[1,50], index: 1, kind: input, shape index: {}]   ;;  %s3134_s3 = inlined_call_operand.vmem [shape: f32[64,32], index: 3, kind: input, shape index: {}]   ;;  %s3135_s4 = inlined_call_operand.vmem [shape: f32[32,256], index: 4, kind: input, shape index: {}]   ;;  %s3136_s5 = inlined_call_operand.vmem [shape: f32[4,128], index: 5, kind: input, shape index: {}]   ;;  %s3137_s6 = inlined_call_operand.vmem [shape: f32[8,256], index: 6, kind: output, shape index: {}]  }
   0x1   :  { %2461 = vset.pattern.permute.xlu0 %v2482_v0  ;;  %v2539_v1 = vld [vmem:[%s3131_s0] sm:$0xff]  ;;  %2463 = vset.pattern.permute.xlu1 %v2483_v2  ;;  %v1693_v3 = vld [vmem:[%s3132_s2 + $0x38] sm:$0xff]  ;;  %v36_v7 = vld [vmem:[%s3132_s2 + $0x8] sm:$0xff]  ;;  %v2486_v12 = vmov 3   ;;  %vm2487_vm0 = vmmov 0   ;;  %v2488_v19 = vmov 0.0  }
   0x2   :  { %43 = vperm.xlu0 %2461, %v2539_v1   ;;  %211 = vperm.xlu1 %2463, %v2539_v1   ;;  %v1694_v4 = vld [vmem:[%s3132_s2 + $0x40] sm:$0xff]  ;;  %v1695_v9 = vld [vmem:[%s3132_s2 + $0x48] sm:$0xff]  ;;  %v1696_v13 = vld [vmem:[%s3132_s2 + $0x50] sm:$0xff]  ;;  %v2489_v20 = vmov 4   ;;  %v2490_v21 = vmov 5   ;;  %v2491_v27 = vmov 6  }
   0x3   :  { %v35_v5 = vld [vmem:[%s3132_s2] sm:$0xff]  ;;  %v2279_v6 = vpack.c.bf16 %v1694_v4, %v1693_v3  ;;  %2278 = vmatprep.subr.bf16.mxu0 %v2484_v8  ;;  %2287 = vmatprep.subr.bf16.mxu1 %v2484_v8  ;;  %v37_v14 = vld [vmem:[%s3132_s2 + $0x10] sm:$0xff]  ;;  %v38_v15 = vld [vmem:[%s3132_s2 + $0x18] sm:$0xff]  ;;  %v2282_v16 = vpack.c.bf16 %v1696_v13, %v1695_v9  ;;  %v2492_v28 = vmov 8   ;;  %vm60_vm1 = vcmask 1041408  }
   0x4   :  { %v2288_v10 = vpack.c.bf16 %v36_v7, %v35_v5  ;;  %v2291_v17 = vpack.c.bf16 %v38_v15, %v37_v14  ;;  %v1697_v18 = vld [vmem:[%s3132_s2 + $0x58] sm:$0xff]  ;;  %2001 = vmatprep.mubr.msk.f32.mxu0 %vm2487_vm0, %v2488_v19  ;;  %2018 = vmatprep.mubr.msk.f32.mxu1 %vm2487_vm0, %v2488_v19  ;;  %v1698_v22 = vld [vmem:[%s3132_s2 + $0x60] sm:$0xff]  ;;  %v40_v24 = vld [vmem:[%s3132_s2 + $0x28] sm:$0xff]  ;;  %v2493_v31 = vmov 7   ;;  %v2494_v32 = vmov 11  }
   0x5   :  { %2280 = vmatpush3.bf16.msra.mxu0 %v2279_v6  ;;  %v39_v23 = vld [vmem:[%s3132_s2 + $0x20] sm:$0xff]  ;;  %v2285_v25 = vpack.c.bf16 %v1698_v22, %v1697_v18  ;;  %v1699_v29 = vld [vmem:[%s3132_s2 + $0x68] sm:$0x3]  ;;  %v41_v30 = vld [vmem:[%s3132_s2 + $0x30] sm:$0x3]  ;;  %v2495_v33 = vmov 9  }
   0x6   :  { %2462 = vset.pattern.permute.xlu0 %v2485_v11  ;;  %2464 = vset.pattern.permute.xlu1 %v2486_v12  ;;  %v2294_v26 = vpack.c.bf16 %v40_v24, %v39_v23  ;;  %v2496_v34 = vmov 14   ;;  %v2497_v35 = vmov 10   ;;  %v2498_v36 = vmov 15   ;;  %v1705_v39 = vld [vmem:[%s3132_s2 + $0x70] sm:$0xff]  ;;  %v1706_v40 = vld [vmem:[%s3132_s2 + $0x78] sm:$0xff]  ;;  %v1707_v44 = vld [vmem:[%s3132_s2 + $0x80] sm:$0xff] }
   0x7   :  { %26 = vperm.xlu0 %2462, %v2539_v1   ;;  %302 = vperm.xlu1 %2464, %v2539_v1   ;;  %v2499_v37 = vmov 12   ;;  %v2500_v38 = vmov 13   ;;  %v2624_v41 = vld [vmem:[%s3133_s1] ss:$0 sm:$0xff]  ;;  %vm56_vm2 = vcmask 408576   ;;  %v2297_v43 = vpack.c.bf16 %v1706_v40, %v1705_v39  ;;  %v1708_v45 = vld [vmem:[%s3132_s2 + $0x88] sm:$0xff] }
   0x8   :  { %2289 = vmatpush3.bf16.msra.mxu1 %v2288_v10  ;;  %2281 = vmatprep.subr.bf16.mxu0 %v2484_v8  ;;  %v1715_v47 = vld [vmem:[%s3132_s2 + $0xa8] sm:$0xff]  ;;  %v1716_v48 = vld [vmem:[%s3132_s2 + $0xb0] sm:$0xff]  ;;  %v2300_v49 = vpack.c.bf16 %v1708_v45, %v1707_v44  ;;  %v1710_v53 = vld [vmem:[%s3132_s2 + $0x98] sm:$0xff] }
   0x9   :  { %2290 = vmatprep.subr.bf16.mxu1 %v2484_v8  ;;  %2283 = vmatpush3.bf16.msra.mxu0 %v2282_v16  ;;  %v2306_v51 = vpack.c.bf16 %v1716_v48, %v1715_v47  ;;  %v1709_v52 = vld [vmem:[%s3132_s2 + $0x90] sm:$0xff]  ;;  %v1717_v54 = vld [vmem:[%s3132_s2 + $0xb8] sm:$0xff]  ;;  %v1718_v55 = vld [vmem:[%s3132_s2 + $0xc0] sm:$0xff] }
   0xa   :  { %2284 = vmatprep.subr.bf16.mxu0 %v2484_v8  ;;  %v2303_v58 = vpack.c.bf16 %v1710_v53, %v1709_v52  ;;  %v2309_v59 = vpack.c.bf16 %v1718_v55, %v1717_v54  ;;  %v1719_v60 = vld [vmem:[%s3132_s2 + $0xc8] sm:$0xff]  ;;  %v1720_v61 = vld [vmem:[%s3132_s2 + $0xd0] sm:$0xff]  ;;  %v1725_v62 = vld [vmem:[%s3132_s2 + $0xe0] sm:$0xff] }
   0xb   :  { %2465 = vset.pattern.permute.xlu1 %v2489_v20  ;;  %2466 = vset.pattern.permute.xlu0 %v2490_v21  ;;  %v1726_v63 = vld [vmem:[%s3132_s2 + $0xe8] sm:$0xff]  ;;  %v1711_v0 = vld [vmem:[%s3132_s2 + $0xa0] sm:$0x3]  ;;  %v1727_v5 = vld [vmem:[%s3132_s2 + $0xf0] sm:$0xff] }
   0xc   :  { %393 = vperm.xlu1 %2465, %v2539_v1   ;;  %484 = vperm.xlu0 %2466, %v2539_v1   ;;  %v2315_v4 = vpack.c.bf16 %v1726_v63, %v1725_v62  ;;  %v1728_v6 = vld [vmem:[%s3132_s2 + $0xf8] sm:$0xff]  ;;  %v1736_v9 = vld [vmem:[%s3132_s2 + $0x120] sm:$0xff]  ;;  %v1730_v15 = vld [vmem:[%s3132_s2 + $0x108] sm:$0xff] }
   0xd   :  { %2292 = vmatpush3.bf16.msra.mxu1 %v2291_v17  ;;  %2286 = vmatpush3.bf16.msra.mxu0 %v2285_v25  ;;  %v1735_v7 = vld [vmem:[%s3132_s2 + $0x118] sm:$0xff]  ;;  %v2318_v12 = vpack.c.bf16 %v1728_v6, %v1727_v5  ;;  %v1729_v14 = vld [vmem:[%s3132_s2 + $0x100] sm:$0xff]  ;;  %v1737_v16 = vld [vmem:[%s3132_s2 + $0x128] sm:$0xff] }
   0xe   :  { %2293 = vmatprep.subr.bf16.mxu1 %v2484_v8  ;;  %1999 = vmatprep.subr.mxu0 %v2488_v19  ;;  %v1721_v10 = vld [vmem:[%s3132_s2 + $0xd8] sm:$0x3]  ;;  %v2324_v13 = vpack.c.bf16 %v1736_v9, %v1735_v7  ;;  %v1738_v17 = vld [vmem:[%s3132_s2 + $0x130] sm:$0xff]  ;;  %v2321_v18 = vpack.c.bf16 %v1730_v15, %v1729_v14  ;;  %v1740_v23 = vld [vmem:[%s3132_s2 + $0x140] sm:$0xff] }
   0xf   :  { %v2327_v20 = vpack.c.bf16 %v1738_v17, %v1737_v16  ;;  %v1739_v22 = vld [vmem:[%s3132_s2 + $0x138] sm:$0xff]  ;;  %v1745_v24 = vld [vmem:[%s3132_s2 + $0x150] sm:$0xff]  ;;  %v1759_v47 = vld [vmem:[%s3132_s2 + $0x1a8] sm:$0xff] }
  0x10   :  { %2467 = vset.pattern.permute.xlu1 %v2491_v27  ;;  %2469 = vset.pattern.permute.xlu0 %v2492_v28  ;;  %v1746_v25 = vld [vmem:[%s3132_s2 + $0x158] sm:$0xff]  ;;  %v1731_v28 = vld [vmem:[%s3132_s2 + $0x110] sm:$0x3]  ;;  %v1751_v53 = vld [vmem:[%s3132_s2 + $0x180] sm:$0x3] }
  0x11   :  { %575 = vperm.xlu1 %2467, %v2539_v1   ;;  %757 = vperm.xlu0 %2469, %v2539_v1   ;;  %v1749_v39 = vld [vmem:[%s3132_s2 + $0x170] sm:$0xff]  ;;  %v1750_v40 = vld [vmem:[%s3132_s2 + $0x178] sm:$0xff]  ;;  %v1780_v9 = vld [vmem:[%s3132_s2 + $0x220] sm:$0xff] }
  0x12   :  { %2295 = vmatpush3.bf16.msra.mxu1 %v2294_v26  ;;  %2000 = vmatpush3.msk.msra.mxu0 %vm60_vm1, %v1699_v29  ;;  %v2330_v26 = vpack.c.bf16 %v1740_v23, %v1739_v22  ;;  %v2339_v45 = vpack.c.bf16 %v1750_v40, %v1749_v39  ;;  %v1760_v48 = vld [vmem:[%s3132_s2 + $0x1b0] sm:$0xff]  ;;  %v1779_v7 = vld [vmem:[%s3132_s2 + $0x218] sm:$0xff]  ;;  %v1787_v17 = vld [vmem:[%s3132_s2 + $0x240] sm:$0xff] }
  0x13   :  { %2016 = vmatprep.subr.mxu1 %v2488_v19  ;;  %2296 = vmatprep.subr.bf16.mxu0 %v2484_v8  ;;  %v1771_v14 = vld [vmem:[%s3132_s2 + $0x1f0] sm:$0x3]  ;;  %v1781_v22 = vld [vmem:[%s3132_s2 + $0x228] sm:$0x3]  ;;  %v1791_v39 = vld [vmem:[%s3132_s2 + $0x260] sm:$0x3] }
  0x15   :  { %2468 = vset.pattern.permute.xlu1 %v2493_v31  ;;  %2472 = vset.pattern.permute.xlu0 %v2494_v32  ;;  %v1747_v31 = vld [vmem:[%s3132_s2 + $0x160] sm:$0xff]  ;;  %v1748_v32 = vld [vmem:[%s3132_s2 + $0x168] sm:$0xff] }
  0x16   :  { %666 = vperm.xlu1 %2468, %v2539_v1   ;;  %1030 = vperm.xlu0 %2472, %v2539_v1  }
  0x17   :  { %2017 = vmatpush3.msk.msra.mxu1 %vm60_vm1, %v41_v30  ;;  %v2333_v30 = vpack.c.bf16 %v1746_v25, %v1745_v24 }
  0x18   :  { %2305 = vmatprep.subr.bf16.mxu1 %v2484_v8 }
  0x1a   :  { %2470 = vset.pattern.permute.xlu1 %v2495_v33  ;;  %2475 = vset.pattern.permute.xlu0 %v2496_v34  ;;  %v1755_v33 = vld [vmem:[%s3132_s2 + $0x188] sm:$0xff]  ;;  %v1756_v34 = vld [vmem:[%s3132_s2 + $0x190] sm:$0xff] }
  0x1b   :  { %848 = vperm.xlu1 %2470, %v2539_v1   ;;  %1303 = vperm.xlu0 %2475, %v2539_v1  }
  0x1f   :  { %2471 = vset.pattern.permute.xlu1 %v2497_v35  ;;  %2477 = vset.pattern.permute.xlu0 %v2498_v36  ;;  %v1741_v35 = vld [vmem:[%s3132_s2 + $0x148] sm:$0x3] }
  0x20   :  { %939 = vperm.xlu1 %2471, %v2539_v1  }
  0x24   :  { %2473 = vset.pattern.permute.xlu1 %v2499_v37  ;;  %v2336_v37 = vpack.c.bf16 %v1748_v32, %v1747_v31 }
  0x25   :  { %1121 = vperm.xlu1 %2473, %v2539_v1  }
  0x29   :  { %2474 = vset.pattern.permute.xlu1 %v2500_v38  ;;  %v2342_v38 = vpack.c.bf16 %v1756_v34, %v1755_v33  ;;  %v1799_v33 = vld [vmem:[%s3132_s2 + $0x288] sm:$0xff]  ;;  %v1800_v34 = vld [vmem:[%s3132_s2 + $0x290] sm:$0xff] }
  0x2a   :  { %1212 = vperm.xlu1 %2474, %v2539_v1  }
  0x2e   :  { %2476 = vset.pattern.permute.xlu1 %v2498_v36 }
  0x2f   :  { %1394 = vperm.xlu1 %2476, %v2539_v1   ;;  %v2312_v1 = vpack.c.bf16 %v1720_v61, %v1719_v60  ;;  %v1761_v60 = vld [vmem:[%s3132_s2 + $0x1b8] sm:$0x3] }
  0x81   :  { %v44_v42 = vpop.permute.xlu0 %43  ;;  %v212_v57 = vpop.permute.xlu1 %211 }
  0x82   :  { %vm45_vm3 = vcmp.eq.s32.totalorder %v44_v42, %v2624_v41  ;;  %vm213_vm5 = vcmp.eq.s32.totalorder %v212_v57, %v2624_v41  ;;  %v1757_v42 = vld [vmem:[%s3132_s2 + $0x198] sm:$0xff] }
  0x83   :  { %v1692_v46 = vsel %vm45_vm3, 1.0, %v2488_v19  ;;  %v1704_v3 = vsel %vm213_vm5, 1.0, %v2488_v19  ;;  %v1768_v57 = vld [vmem:[%s3132_s2 + $0x1d8] sm:$0xff] }
  0x84   :  { %2002 = vmatmul.mubr.msk.f32.vlgmr.msra.gmra.mrb[0].mxu0 %vm56_vm2, %v1692_v46 }
  0x85   :  { %2298 = vmatpush3.bf16.msra.mxu0 %v2297_v43  ;;  %2035 = vmatprep.mubr.msk.f32.mxu0 %vm2487_vm0, %v2488_v19  ;;  %v1758_v43 = vld [vmem:[%s3132_s2 + $0x1a0] sm:$0xff] }
  0x86   :  { %v27_v50 = vpop.permute.xlu0 %26  ;;  %2299 = vmatprep.subr.bf16.mxu0 %v2484_v8  ;;  %v303_v2 = vpop.permute.xlu1 %302  ;;  %v2345_v46 = vpack.c.bf16 %v1758_v43, %v1757_v42  ;;  %v1807_v43 = vld [vmem:[%s3132_s2 + $0x2b0] sm:$0xff] }
  0x87   :  { %vm32_vm4 = vcmp.eq.s32.totalorder %v27_v50, %v2624_v41  ;;  %vm304_vm6 = vcmp.eq.s32.totalorder %v303_v2, %v2624_v41  ;;  %v1766_v50 = vld [vmem:[%s3132_s2 + $0x1c8] sm:$0xff] }
  0x88   :  { %v1691_v56 = vsel %vm32_vm4, 1.0, %v2488_v19  ;;  %v1714_v11 = vsel %vm304_vm6, 1.0, %v2488_v19  ;;  %v1777_v2 = vld [vmem:[%s3132_s2 + $0x208] sm:$0xff] }
  0x89   :  { %2301 = vmatpush3.bf16.msra.mxu0 %v2300_v49  ;;  %2019 = vmatmul.mubr.msk.f32.vlgmr.msra.gmra.mrb[0].mxu1 %vm56_vm2, %v1691_v56  ;;  %v1765_v49 = vld [vmem:[%s3132_s2 + $0x1c0] sm:$0xff]  ;;  %v1767_v56 = vld [vmem:[%s3132_s2 + $0x1d0] sm:$0xff] }
  0x8a   :  { %2307 = vmatpush3.bf16.msra.mxu1 %v2306_v51  ;;  %2302 = vmatprep.subr.bf16.mxu0 %v2484_v8  ;;  %v2348_v51 = vpack.c.bf16 %v1760_v48, %v1759_v47  ;;  %v2351_v55 = vpack.c.bf16 %v1766_v50, %v1765_v49  ;;  %v2354_v62 = vpack.c.bf16 %v1768_v57, %v1767_v56  ;;  %v1801_v47 = vld [vmem:[%s3132_s2 + $0x298] sm:$0x3] }
  0x8b   :  { %2308 = vmatprep.subr.bf16.mxu1 %v2484_v8  ;;  %2052 = vmatprep.mubr.msk.f32.mxu1 %vm2487_vm0, %v2488_v19  ;;  %v394_v21 = vpop.permute.xlu1 %393  ;;  %v485_v27 = vpop.permute.xlu0 %484 }
  0x8c   :  { %vm395_vm7 = vcmp.eq.s32.totalorder %v394_v21, %v2624_v41  ;;  %vm486_vm8 = vcmp.eq.s32.totalorder %v485_v27, %v2624_v41  ;;  %v1796_v21 = vld [vmem:[%s3132_s2 + $0x270] sm:$0xff]  ;;  %v1790_v27 = vld [vmem:[%s3132_s2 + $0x258] sm:$0xff] }
  0x8d   :  { %2304 = vmatpush3.bf16.msra.mxu0 %v2303_v58  ;;  %v1724_v29 = vsel %vm395_vm7, 1.0, %v2488_v19  ;;  %v1734_v36 = vsel %vm486_vm8, 1.0, %v2488_v19  ;;  %v1775_v58 = vld [vmem:[%s3132_s2 + $0x1f8] sm:$0xff] }
  0x8e   :  { %2310 = vmatpush3.bf16.msra.mxu1 %v2309_v59  ;;  %2033 = vmatprep.subr.mxu0 %v2488_v19  ;;  %v1776_v59 = vld [vmem:[%s3132_s2 + $0x200] sm:$0xff] }
  0x8f   :  { %2311 = vmatprep.subr.bf16.mxu1 %v2484_v8  ;;  %v2360_v63 = vpack.c.bf16 %v1776_v59, %v1775_v58  ;;  %v1819_v58 = vld [vmem:[%s3132_s2 + $0x2f8] sm:$0xff]  ;;  %v1820_v59 = vld [vmem:[%s3132_s2 + $0x300] sm:$0xff] }
  0x90   :  { %v576_v44 = vpop.permute.xlu1 %575  ;;  %v758_v6 = vpop.permute.xlu0 %757 }
  0x91   :  { %2034 = vmatpush3.msk.msra.mxu0 %vm60_vm1, %v1711_v0  ;;  %vm577_vm9 = vcmp.eq.s32.totalorder %v576_v44, %v2624_v41  ;;  %v1769_v0 = vld [vmem:[%s3132_s2 + $0x1e0] sm:$0xff]  ;;  %vm759_vm11 = vcmp.eq.s32.totalorder %v758_v6, %v2624_v41  ;;  %v1808_v44 = vld [vmem:[%s3132_s2 + $0x2b8] sm:$0xff]  ;;  %v1836_v6 = vld [vmem:[%s3132_s2 + $0x350] sm:$0xff] }
  0x92   :  { %2036 = vmatmul.mubr.msk.f32.vlgmr.msra.gmra.mrb[2].mxu0 %vm56_vm2, %v1704_v3  ;;  %2313 = vmatpush3.bf16.msra.mxu1 %v2312_v1  ;;  %v1744_v54 = vsel %vm577_vm9, 1.0, %v2488_v19  ;;  %v1770_v1 = vld [vmem:[%s3132_s2 + $0x1e8] sm:$0xff]  ;;  %v1778_v3 = vld [vmem:[%s3132_s2 + $0x210] sm:$0xff]  ;;  %v1764_v15 = vsel %vm759_vm11, 1.0, %v2488_v19  ;;  %v2390_v49 = vpack.c.bf16 %v1808_v44, %v1807_v43 }
  0x93   :  { %2314 = vmatprep.subr.bf16.mxu0 %v2484_v8  ;;  %2050 = vmatprep.subr.mxu1 %v2488_v19  ;;  %v2363_v5 = vpack.c.bf16 %v1778_v3, %v1777_v2  ;;  %v1827_v3 = vld [vmem:[%s3132_s2 + $0x320] sm:$0xff] }
  0x94   :  { %2316 = vmatpush3.bf16.msra.mxu0 %v2315_v4  ;;  %2069 = vmatprep.mubr.msk.f32.mxu0 %vm2487_vm0, %v2488_v19  ;;  %v2357_v4 = vpack.c.bf16 %v1770_v1, %v1769_v0  ;;  %v1811_v0 = vld [vmem:[%s3132_s2 + $0x2d0] sm:$0x3] }
  0x95   :  { %2317 = vmatprep.subr.bf16.mxu0 %v2484_v8  ;;  %v667_v52 = vpop.permute.xlu1 %666 }
  0x96   :  { %2051 = vmatpush3.msk.msra.mxu1 %vm60_vm1, %v1721_v10  ;;  %vm668_vm10 = vcmp.eq.s32.totalorder %v667_v52, %v2624_v41  ;;  %v1785_v10 = vld [vmem:[%s3132_s2 + $0x230] sm:$0xff]  ;;  %v1810_v52 = vld [vmem:[%s3132_s2 + $0x2c8] sm:$0xff] }
  0x97   :  { %2053 = vmatmul.mubr.msk.f32.vlgmr.msra.gmra.mrb[2].mxu1 %vm56_vm2, %v1714_v11  ;;  %2323 = vmatprep.subr.bf16.mxu1 %v2484_v8  ;;  %v1754_v61 = vsel %vm668_vm10, 1.0, %v2488_v19  ;;  %v1786_v11 = vld [vmem:[%s3132_s2 + $0x238] sm:$0xff] }
  0x98   :  { %2319 = vmatpush3.bf16.msra.mxu0 %v2318_v12  ;;  %2325 = vmatpush3.bf16.msra.mxu1 %v2324_v13  ;;  %v2366_v12 = vpack.c.bf16 %v1780_v9, %v1779_v7  ;;  %v2369_v16 = vpack.c.bf16 %v1786_v11, %v1785_v10  ;;  %v1821_v7 = vld [vmem:[%s3132_s2 + $0x308] sm:$0x3] }
  0x99   :  { %2320 = vmatprep.subr.bf16.mxu0 %v2484_v8  ;;  %2326 = vmatprep.subr.bf16.mxu1 %v2484_v8 }
  0x9a   :  { %2086 = vmatprep.mubr.msk.f32.mxu1 %vm2487_vm0, %v2488_v19  ;;  %v849_v13 = vpop.permute.xlu1 %848 }
  0x9b   :  { %vm850_vm12 = vcmp.eq.s32.totalorder %v849_v13, %v2624_v41  ;;  %v1830_v13 = vld [vmem:[%s3132_s2 + $0x338] sm:$0xff] }
  0x9c   :  { %2322 = vmatpush3.bf16.msra.mxu0 %v2321_v18  ;;  %2328 = vmatpush3.bf16.msra.mxu1 %v2327_v20  ;;  %v1788_v18 = vld [vmem:[%s3132_s2 + $0x248] sm:$0xff]  ;;  %v1774_v23 = vsel %vm850_vm12, 1.0, %v2488_v19 }
  0x9d   :  { %2067 = vmatprep.subr.mxu0 %v2488_v19  ;;  %2329 = vmatprep.subr.bf16.mxu1 %v2484_v8  ;;  %v1795_v20 = vld [vmem:[%s3132_s2 + $0x268] sm:$0xff]  ;;  %v2372_v24 = vpack.c.bf16 %v1788_v18, %v1787_v17 }
  0x9e   :  { %v2378_v25 = vpack.c.bf16 %v1796_v21, %v1795_v20  ;;  %v1839_v20 = vld [vmem:[%s3132_s2 + $0x368] sm:$0xff]  ;;  %v1840_v21 = vld [vmem:[%s3132_s2 + $0x370] sm:$0xff] }
  0x9f   :  { %v940_v32 = vpop.permute.xlu1 %939 }
  0xa0   :  { %2068 = vmatpush3.msk.msra.mxu0 %vm60_vm1, %v1731_v28  ;;  %2331 = vmatpush3.bf16.msra.mxu1 %v2330_v26  ;;  %v1789_v26 = vld [vmem:[%s3132_s2 + $0x250] sm:$0xff]  ;;  %v1797_v28 = vld [vmem:[%s3132_s2 + $0x278] sm:$0xff]  ;;  %vm941_vm13 = vcmp.eq.s32.totalorder %v940_v32, %v2624_v41  ;;  %v1495_v32 = vld [vmem:[%s3134_s3 + $0x20] sm:$0xff] }
  0xa1   :  { %2070 = vmatmul.mubr.msk.f32.vlgmr.msra.gmra.mrb[4].mxu0 %vm56_vm2, %v1724_v29  ;;  %2332 = vmatprep.subr.bf16.mxu0 %v2484_v8  ;;  %v1798_v29 = vld [vmem:[%s3132_s2 + $0x280] sm:$0xff]  ;;  %v1784_v40 = vsel %vm941_vm13, 1.0, %v2488_v19 }
  0xa2   :  { %2334 = vmatpush3.bf16.msra.mxu0 %v2333_v30  ;;  %2084 = vmatprep.subr.mxu1 %v2488_v19  ;;  %v2375_v30 = vpack.c.bf16 %v1790_v27, %v1789_v26  ;;  %v2381_v31 = vpack.c.bf16 %v1798_v29, %v1797_v28  ;;  %v1841_v26 = vld [vmem:[%s3132_s2 + $0x378] sm:$0x3]  ;;  %v1492_v28 = vld [vmem:[%s3134_s3 + $0x8] sm:$0xff] }
  0xa3   :  { %2335 = vmatprep.subr.bf16.mxu0 %v2484_v8  ;;  %2103 = vmatprep.mubr.msk.f32.mxu0 %vm2487_vm0, %v2488_v19 }
  0xa4   :  { %2085 = vmatpush3.msk.msra.mxu1 %vm60_vm1, %v1741_v35  ;;  %v1805_v35 = vld [vmem:[%s3132_s2 + $0x2a0] sm:$0xff] }
  0xa5   :  { %2087 = vmatmul.mubr.msk.f32.vlgmr.msra.gmra.mrb[4].mxu1 %vm56_vm2, %v1734_v36  ;;  %2341 = vmatprep.subr.bf16.mxu1 %v2484_v8  ;;  %v1806_v36 = vld [vmem:[%s3132_s2 + $0x2a8] sm:$0xff] }
  0xa6   :  { %2337 = vmatpush3.bf16.msra.mxu0 %v2336_v37  ;;  %2343 = vmatpush3.bf16.msra.mxu1 %v2342_v38  ;;  %v2384_v37 = vpack.c.bf16 %v1800_v34, %v1799_v33  ;;  %v1031_v38 = vpop.permute.xlu0 %1030  ;;  %v2387_v42 = vpack.c.bf16 %v1806_v36, %v1805_v35  ;;  %v1496_v33 = vld [vmem:[%s3134_s3 + $0x28] sm:$0xff]  ;;  %v1497_v35 = vld [vmem:[%s3134_s3 + $0x30] sm:$0xff]  ;;  %v1498_v36 = vld [vmem:[%s3134_s3 + $0x38] sm:$0xff] }
  0xa7   :  { %2338 = vmatprep.subr.bf16.mxu0 %v2484_v8  ;;  %2344 = vmatprep.subr.bf16.mxu1 %v2484_v8  ;;  %vm1032_vm14 = vcmp.eq.s32.totalorder %v1031_v38, %v2624_v41  ;;  %v2429_v34 = vpack.c.bf16 %v1496_v33, %v1495_v32  ;;  %v1580_v38 = vld [vmem:[%s3135_s4 + $0x8] sm:$0xff]  ;;  %v1583_v33 = vld [vmem:[%s3135_s4 + $0x20] sm:$0xff] }
  0xa8   :  { %2120 = vmatprep.mubr.msk.f32.mxu1 %vm2487_vm0, %v2488_v19  ;;  %v1794_v48 = vsel %vm1032_vm14, 1.0, %v2488_v19 }
  0xaa   :  { %2340 = vmatpush3.bf16.msra.mxu0 %v2339_v45  ;;  %2346 = vmatpush3.bf16.msra.mxu1 %v2345_v46  ;;  %v1815_v45 = vld [vmem:[%s3132_s2 + $0x2d8] sm:$0xff]  ;;  %v1816_v46 = vld [vmem:[%s3132_s2 + $0x2e0] sm:$0xff]  ;;  %v1304_v18 = vpop.permute.xlu0 %1303 }
  0xab   :  { %2101 = vmatprep.subr.mxu0 %v2488_v19  ;;  %2347 = vmatprep.subr.bf16.mxu1 %v2484_v8  ;;  %v2396_v50 = vpack.c.bf16 %v1816_v46, %v1815_v45  ;;  %vm1305_vm4 = vcmp.eq.s32.totalorder %v1304_v18, %v2624_v41 }
  0xae   :  { %2102 = vmatpush3.msk.msra.mxu0 %vm60_vm1, %v1751_v53  ;;  %2349 = vmatpush3.bf16.msra.mxu1 %v2348_v51  ;;  %v1809_v51 = vld [vmem:[%s3132_s2 + $0x2c0] sm:$0xff]  ;;  %v1817_v53 = vld [vmem:[%s3132_s2 + $0x2e8] sm:$0xff] }
  0xaf   :  { %2104 = vmatmul.mubr.msk.f32.vlgmr.msra.gmra.mrb[6].mxu0 %vm56_vm2, %v1744_v54  ;;  %2350 = vmatprep.subr.bf16.mxu0 %v2484_v8  ;;  %v1818_v54 = vld [vmem:[%s3132_s2 + $0x2f0] sm:$0xff]  ;;  %v2393_v56 = vpack.c.bf16 %v1810_v52, %v1809_v51 }
  0xb0   :  { %2352 = vmatpush3.bf16.msra.mxu0 %v2351_v55  ;;  %2118 = vmatprep.subr.mxu1 %v2488_v19  ;;  %v1122_v55 = vpop.permute.xlu1 %1121  ;;  %v2399_v57 = vpack.c.bf16 %v1818_v54, %v1817_v53 }
  0xb1   :  { %2353 = vmatprep.subr.bf16.mxu0 %v2484_v8  ;;  %2137 = vmatprep.mubr.msk.f32.mxu0 %vm2487_vm0, %v2488_v19  ;;  %vm1123_vm15 = vcmp.eq.s32.totalorder %v1122_v55, %v2624_v41 }
  0xb2   :  { %2119 = vmatpush3.msk.msra.mxu1 %vm60_vm1, %v1761_v60  ;;  %v1825_v60 = vld [vmem:[%s3132_s2 + $0x310] sm:$0xff]  ;;  %v1804_v1 = vsel %vm1123_vm15, 1.0, %v2488_v19 }
  0xb3   :  { %2121 = vmatmul.mubr.msk.f32.vlgmr.msra.gmra.mrb[6].mxu1 %vm56_vm2, %v1754_v61  ;;  %2359 = vmatprep.subr.bf16.mxu1 %v2484_v8  ;;  %v1826_v61 = vld [vmem:[%s3132_s2 + $0x318] sm:$0xff] }
  0xb4   :  { %2355 = vmatpush3.bf16.msra.mxu0 %v2354_v62  ;;  %2361 = vmatpush3.bf16.msra.mxu1 %v2360_v63  ;;  %v2402_v62 = vpack.c.bf16 %v1820_v59, %v1819_v58  ;;  %v1213_v63 = vpop.permute.xlu1 %1212  ;;  %v2405_v2 = vpack.c.bf16 %v1826_v61, %v1825_v60 }
  0xb5   :  { %2356 = vmatprep.subr.bf16.mxu0 %v2484_v8  ;;  %2362 = vmatprep.subr.bf16.mxu1 %v2484_v8  ;;  %vm1214_vm3 = vcmp.eq.s32.totalorder %v1213_v63, %v2624_v41 }
  0xb6   :  { %2154 = vmatprep.mubr.msk.f32.mxu1 %vm2487_vm0, %v2488_v19  ;;  %v1814_v9 = vsel %vm1214_vm3, 1.0, %v2488_v19 }
  0xb8   :  { %2358 = vmatpush3.bf16.msra.mxu0 %v2357_v4  ;;  %2364 = vmatpush3.bf16.msra.mxu1 %v2363_v5  ;;  %v1828_v4 = vld [vmem:[%s3132_s2 + $0x328] sm:$0xff] }
  0xb9   :  { %2135 = vmatprep.subr.mxu0 %v2488_v19  ;;  %2365 = vmatprep.subr.bf16.mxu1 %v2484_v8  ;;  %v1835_v5 = vld [vmem:[%s3132_s2 + $0x348] sm:$0xff]  ;;  %v2408_v10 = vpack.c.bf16 %v1828_v4, %v1827_v3 }
  0xba   :  { %v2414_v11 = vpack.c.bf16 %v1836_v6, %v1835_v5 }
  0xbc   :  { %2136 = vmatpush3.msk.msra.mxu0 %vm60_vm1, %v1771_v14  ;;  %2367 = vmatpush3.bf16.msra.mxu1 %v2366_v12  ;;  %v1829_v12 = vld [vmem:[%s3132_s2 + $0x330] sm:$0xff]  ;;  %v1837_v14 = vld [vmem:[%s3132_s2 + $0x358] sm:$0xff] }
  0xbd   :  { %2138 = vmatmul.mubr.msk.f32.vlgmr.msra.gmra.mrb[8].mxu0 %vm56_vm2, %v1764_v15  ;;  %2368 = vmatprep.subr.bf16.mxu0 %v2484_v8  ;;  %v1838_v15 = vld [vmem:[%s3132_s2 + $0x360] sm:$0xff] }
  0xbe   :  { %2370 = vmatpush3.bf16.msra.mxu0 %v2369_v16  ;;  %2152 = vmatprep.subr.mxu1 %v2488_v19  ;;  %v2411_v16 = vpack.c.bf16 %v1830_v13, %v1829_v12  ;;  %v2417_v17 = vpack.c.bf16 %v1838_v15, %v1837_v14 }
  0xbf   :  { %2371 = vmatprep.subr.bf16.mxu0 %v2484_v8  ;;  %2171 = vmatprep.mubr.msk.f32.mxu0 %vm2487_vm0, %v2488_v19 }
  0xc0   :  { %2153 = vmatpush3.msk.msra.mxu1 %vm60_vm1, %v1781_v22  ;;  %v2420_v22 = vpack.c.bf16 %v1840_v21, %v1839_v20 }
  0xc1   :  { %2155 = vmatmul.mubr.msk.f32.vlgmr.msra.gmra.mrb[8].mxu1 %vm56_vm2, %v1774_v23  ;;  %2377 = vmatprep.subr.bf16.mxu1 %v2484_v8  ;;  %v1395_v23 = vpop.permute.xlu1 %1394 }
  0xc2   :  { %2373 = vmatpush3.bf16.msra.mxu0 %v2372_v24  ;;  %2379 = vmatpush3.bf16.msra.mxu1 %v2378_v25  ;;  %v1831_v24 = vld [vmem:[%s3132_s2 + $0x340] sm:$0x3]  ;;  %v1824_v25 = vsel %vm1305_vm4, 1.0, %v2488_v19  ;;  %vm1396_vm5 = vcmp.eq.s32.totalorder %v1395_v23, %v2624_v41 }
  0xc3   :  { %2374 = vmatprep.subr.bf16.mxu0 %v2484_v8  ;;  %2380 = vmatprep.subr.bf16.mxu1 %v2484_v8  ;;  %v1834_v27 = vsel %vm1396_vm5, 1.0, %v2488_v19  ;;  %v1491_v41 = vld [vmem:[%s3134_s3] sm:$0xff] }
  0xc4   :  { %2188 = vmatprep.mubr.msk.f32.mxu1 %vm2487_vm0, %v2488_v19  ;;  %v2423_v29 = vpack.c.bf16 %v1492_v28, %v1491_v41 }
  0xc6   :  { %2376 = vmatpush3.bf16.msra.mxu0 %v2375_v30  ;;  %2382 = vmatpush3.bf16.msra.mxu1 %v2381_v31  ;;  %v1493_v30 = vld [vmem:[%s3134_s3 + $0x10] sm:$0xff] }
  0xc7   :  { %2169 = vmatprep.subr.mxu0 %v2488_v19  ;;  %2383 = vmatprep.subr.bf16.mxu1 %v2484_v8 }
  0xca   :  { %2170 = vmatpush3.msk.msra.mxu0 %vm60_vm1, %v1791_v39  ;;  %2385 = vmatpush3.bf16.msra.mxu1 %v2384_v37  ;;  %v2432_v37 = vpack.c.bf16 %v1498_v36, %v1497_v35  ;;  %v1582_v39 = vld [vmem:[%s3135_s4 + $0x18] sm:$0xff]  ;;  %v1845_v36 = vld [vmem:[%s3136_s5 + $0x1] ss:$0 sm:$0xff] }
  0xcb   :  { %2172 = vmatmul.mubr.msk.f32.vlgmr.msra.gmra.mrb[10].mxu0 %vm56_vm2, %v1784_v40  ;;  %2386 = vmatprep.subr.bf16.mxu0 %v2484_v8  ;;  %v2434_v40 = vpack.c.bf16 %v1582_v39, %v1580_v38 }
  0xcc   :  { %2388 = vmatpush3.bf16.msra.mxu0 %v2387_v42  ;;  %2186 = vmatprep.subr.mxu1 %v2488_v19  ;;  %v1581_v42 = vld [vmem:[%s3135_s4 + $0x10] sm:$0xff] }
  0xcd   :  { %2389 = vmatprep.subr.bf16.mxu0 %v2484_v8  ;;  %2205 = vmatprep.mubr.msk.f32.mxu0 %vm2487_vm0, %v2488_v19 }
  0xce   :  { %2187 = vmatpush3.msk.msra.mxu1 %vm60_vm1, %v1801_v47 }
  0xcf   :  { %2189 = vmatmul.mubr.msk.f32.vlgmr.msra.gmra.mrb[10].mxu1 %vm56_vm2, %v1794_v48  ;;  %2395 = vmatprep.subr.bf16.mxu1 %v2484_v8 }
  0xd0   :  { %2391 = vmatpush3.bf16.msra.mxu0 %v2390_v49  ;;  %2397 = vmatpush3.bf16.msra.mxu1 %v2396_v50 }
  0xd1   :  { %2392 = vmatprep.subr.bf16.mxu0 %v2484_v8  ;;  %2398 = vmatprep.subr.bf16.mxu1 %v2484_v8 }
  0xd2   :  { %2222 = vmatprep.mubr.msk.f32.mxu1 %vm2487_vm0, %v2488_v19 }
  0xd4   :  { %2394 = vmatpush3.bf16.msra.mxu0 %v2393_v56  ;;  %2400 = vmatpush3.bf16.msra.mxu1 %v2399_v57 }
  0xd5   :  { %2203 = vmatprep.subr.mxu0 %v2488_v19  ;;  %2401 = vmatprep.subr.bf16.mxu1 %v2484_v8 }
  0xd8   :  { %2204 = vmatpush3.msk.msra.mxu0 %vm60_vm1, %v1811_v0  ;;  %2403 = vmatpush3.bf16.msra.mxu1 %v2402_v62 }
  0xd9   :  { %2206 = vmatmul.mubr.msk.f32.vlgmr.msra.gmra.mrb[12].mxu0 %vm56_vm2, %v1804_v1  ;;  %2404 = vmatprep.subr.bf16.mxu0 %v2484_v8 }
  0xda   :  { %2406 = vmatpush3.bf16.msra.mxu0 %v2405_v2  ;;  %2220 = vmatprep.subr.mxu1 %v2488_v19 }
  0xdb   :  { %2407 = vmatprep.subr.bf16.mxu0 %v2484_v8  ;;  %2239 = vmatprep.mubr.msk.f32.mxu0 %vm2487_vm0, %v2488_v19 }
  0xdc   :  { %2221 = vmatpush3.msk.msra.mxu1 %vm60_vm1, %v1821_v7 }
  0xdd   :  { %2223 = vmatmul.mubr.msk.f32.vlgmr.msra.gmra.mrb[12].mxu1 %vm56_vm2, %v1814_v9  ;;  %2413 = vmatprep.subr.bf16.mxu1 %v2484_v8 }
  0xde   :  { %2409 = vmatpush3.bf16.msra.mxu0 %v2408_v10  ;;  %2415 = vmatpush3.bf16.msra.mxu1 %v2414_v11 }
  0xdf   :  { %2410 = vmatprep.subr.bf16.mxu0 %v2484_v8  ;;  %2416 = vmatprep.subr.bf16.mxu1 %v2484_v8 }
  0xe0   :  { %2256 = vmatprep.mubr.msk.f32.mxu1 %vm2487_vm0, %v2488_v19 }
  0xe2   :  { %2412 = vmatpush3.bf16.msra.mxu0 %v2411_v16  ;;  %2418 = vmatpush3.bf16.msra.mxu1 %v2417_v17 }
  0xe3   :  { %2237 = vmatprep.subr.mxu0 %v2488_v19  ;;  %2419 = vmatprep.subr.bf16.mxu1 %v2484_v8 }
  0xe6   :  { %2238 = vmatpush3.msk.msra.mxu0 %vm60_vm1, %v1831_v24  ;;  %2421 = vmatpush3.bf16.msra.mxu1 %v2420_v22 }
  0xe7   :  { %2240 = vmatmul.mubr.msk.f32.vlgmr.msra.gmra.mrb[14].mxu0 %vm56_vm2, %v1824_v25  ;;  %2254 = vmatprep.subr.mxu1 %v2488_v19 }
  0xe8   :  { %2422 = vmatprep.subr.bf16.mxu0 %v2484_v8  ;;  %2275 = vmatprep.mubr.msk.f32.mxu0 %vm2487_vm0, %v2488_v19  ;;  %vm1504_vm0 = vcmask 523264  }
  0xe9   :  { %2424 = vmatpush3.bf16.msra.mxu0 %v2423_v29 }
  0xea   :  { %2255 = vmatpush3.msk.msra.mxu1 %vm60_vm1, %v1841_v26  ;;  %2425 = vmatprep.subr.bf16.mxu0 %v2484_v8  ;;  %vm1587_vm1 = vcmask 261120  }
  0xeb   :  { %2257 = vmatmul.mubr.msk.f32.vlgmr.msra.gmra.mrb[14].mxu1 %vm56_vm2, %v1834_v27  ;;  %2435 = vmatprep.subr.bf16.mxu1 %v2434_v40  ;;  %v1844_v27 = vld [vmem:[%s3136_s5] ss:$0 sm:$0xff]  ;;  %v1848_v40 = vld [vmem:[%s3136_s5 + $0x2] ss:$0 sm:$0xff] }
  0xec   :  { %1655 = vmatprep.mubr.f32.mxu1 %v2488_v19  ;;  %v1494_v19 = vld [vmem:[%s3134_s3 + $0x18] sm:$0xff] }
  0xed   :  { %v2426_v31 = vpack.c.bf16 %v1494_v19, %v1493_v30  ;;  %v1584_v19 = vld [vmem:[%s3135_s4 + $0x28] sm:$0xff] }
  0xef   :  { %2427 = vmatpush3.bf16.msra.mxu0 %v2426_v31  ;;  %v1586_v31 = vld [vmem:[%s3135_s4 + $0x38] sm:$0xff] }
  0xf0   :  { %2428 = vmatprep.subr.bf16.mxu0 %v2484_v8  ;;  %v2438_v32 = vpack.c.bf16 %v1586_v31, %v1584_v19 }
  0xf3   :  { %2430 = vmatpush3.bf16.msra.mxu0 %v2429_v34  ;;  %v1585_v34 = vld [vmem:[%s3135_s4 + $0x30] sm:$0xff] }
  0xf4   :  { %2431 = vmatprep.subr.bf16.mxu0 %v2484_v8  ;;  %v1579_v8 = vld [vmem:[%s3135_s4] sm:$0xff]  ;;  %v2440_v35 = vpack.c.bf16 %v1585_v34, %v1583_v33 }
  0xf5   :  { %v2436_v43 = vpack.c.bf16 %v1581_v42, %v1579_v8  ;;  %v1849_v42 = vld [vmem:[%s3136_s5 + $0x3] ss:$0 sm:$0xff] }
  0xf7   :  { %2433 = vmatpush3.bf16.msra.mxu0 %v2432_v37  ;;  %2437 = vmatpush1.bf16.msra.mxu1 %v2436_v43 }
  0xf8   :  { %2439 = vmatprep.subr.bf16.mxu1 %v2438_v32 }
  0xfb   :  { %2441 = vmatpush1.bf16.msra.mxu1 %v2440_v35 }
 0x157   :  { %v130_v44 = vpop.f32.mrb[0].mxu0 }
 0x158   :  { %v2003_v45 = vpop.f32.mrb[1].mxu0 }
 0x15c   :  { %v206_v46 = vpop.f32.mrb[0].mxu1 }
 0x15d   :  { %v207_v47 = vadd.f32 %v206_v46, %v130_v44  ;;  %v2020_v48 = vpop.f32.mrb[1].mxu1 }
 0x165   :  { %v296_v49 = vpop.f32.mrb[2].mxu0 }
 0x166   :  { %v300_v50 = vadd.f32 %v296_v49, %v207_v47  ;;  %v2037_v51 = vpop.f32.mrb[3].mxu0 }
 0x16a   :  { %v387_v52 = vpop.f32.mrb[2].mxu1 }
 0x16b   :  { %v391_v53 = vadd.f32 %v387_v52, %v300_v50  ;;  %v2054_v54 = vpop.f32.mrb[3].mxu1 }
 0x174   :  { %v478_v55 = vpop.f32.mrb[4].mxu0 }
 0x175   :  { %v482_v56 = vadd.f32 %v478_v55, %v391_v53  ;;  %v2071_v57 = vpop.f32.mrb[5].mxu0 }
 0x178   :  { %v569_v58 = vpop.f32.mrb[4].mxu1 }
 0x179   :  { %v573_v59 = vadd.f32 %v569_v58, %v482_v56  ;;  %v2088_v60 = vpop.f32.mrb[5].mxu1 }
 0x182   :  { %v660_v61 = vpop.f32.mrb[6].mxu0 }
 0x183   :  { %v664_v62 = vadd.f32 %v660_v61, %v573_v59  ;;  %v2105_v63 = vpop.f32.mrb[7].mxu0 }
 0x186   :  { %v751_v0 = vpop.f32.mrb[6].mxu1 }
 0x187   :  { %v755_v1 = vadd.f32 %v751_v0, %v664_v62  ;;  %v2122_v2 = vpop.f32.mrb[7].mxu1 }
 0x190   :  { %v842_v3 = vpop.f32.mrb[8].mxu0 }
 0x191   :  { %v846_v4 = vadd.f32 %v842_v3, %v755_v1  ;;  %v2139_v5 = vpop.f32.mrb[9].mxu0 }
 0x194   :  { %v933_v6 = vpop.f32.mrb[8].mxu1 }
 0x195   :  { %v937_v7 = vadd.f32 %v933_v6, %v846_v4  ;;  %v2156_v9 = vpop.f32.mrb[9].mxu1 }
 0x19e   :  { %v1024_v10 = vpop.f32.mrb[10].mxu0 }
 0x19f   :  { %v1028_v11 = vadd.f32 %v1024_v10, %v937_v7  ;;  %v2173_v12 = vpop.f32.mrb[11].mxu0 }
 0x1a2   :  { %v1115_v13 = vpop.f32.mrb[10].mxu1 }
 0x1a3   :  { %v1119_v14 = vadd.f32 %v1115_v13, %v1028_v11  ;;  %v2190_v15 = vpop.f32.mrb[11].mxu1 }
 0x1ac   :  { %v1206_v16 = vpop.f32.mrb[12].mxu0 }
 0x1ad   :  { %v1210_v17 = vadd.f32 %v1206_v16, %v1119_v14  ;;  %v2207_v18 = vpop.f32.mrb[13].mxu0 }
 0x1b0   :  { %v1297_v20 = vpop.f32.mrb[12].mxu1 }
 0x1b1   :  { %v1301_v21 = vadd.f32 %v1297_v20, %v1210_v17  ;;  %v2224_v22 = vpop.f32.mrb[13].mxu1 }
 0x1ba   :  { %v1388_v23 = vpop.f32.mrb[14].mxu0 }
 0x1bb   :  { %v1392_v24 = vadd.f32 %v1388_v23, %v1301_v21  ;;  %v2241_v25 = vpop.f32.mrb[15].mxu0 }
 0x1be   :  { %v1479_v26 = vpop.f32.mrb[14].mxu1 }
 0x1bf   :  { %v1483_v41 = vadd.f32 %v1479_v26, %v1392_v24  ;;  %v2258_v28 = vpop.f32.mrb[15].mxu1 }
 0x1c1   :  { %v1489_v29 = vadd.f32 %v1844_v27, %v1483_v41 }
 0x1c3   :  { %v1490_v30 = vmax.f32 %v1489_v29, 0.0 }
 0x1c5   :  { %2276 = vmatmul.mubr.msk.f32.vlgmr.msra.gmra.mrb[16].mxu0 %vm1504_vm0, %v1490_v30 }
 0x298   :  { %v1574_v37 = vpop.f32.mrb[16].mxu0 }
 0x299   :  { %v1575_v38 = vadd.f32 %v1845_v36, %v1574_v37  ;;  %v2277_v39 = vpop.f32.mrb[17].mxu0 }
 0x29b   :  { %v1578_v8 = vmax.f32 %v1575_v38, 0.0 }
 0x29d   :  { %1847 = vmatmul.mubr.msk.f32.vlgmr.msra.gmra.mrb[16].mxu1 %vm1587_vm1, %v1578_v8 }
 0x370   :  { %v1657_v43 = vpop.f32.mrb[16].mxu1 }
 0x371   :  { %v1667_v44 = vadd.f32 %v1848_v40, %v1657_v43  ;;  %v1659_v45 = vpop.f32.mrb[17].mxu1 }
 0x372   :  { %v1673_v46 = vadd.f32 %v1849_v42, %v1659_v45 }
 0x373   :  { %1683 = vst [vmem:[%s3137_s6] sm:$0xff] %v1667_v44 }
 0x374   :  { %1674 = vmax.xlane.f32.xlu1 %v1673_v46 }
 0x401   :  { %v1675_v47 = vpop.xlane.xlu1 %1674 }
 0x402   :  { %v1676_v48 = vsub.f32 %v1673_v46, %v1675_v47 }
 0x404   :  { %v1677_v49 = vmul.f32 1.442695, %v1676_v48 }
 0x406   :  { %2478 = vpow2.f32 %v1677_v49 }
 0x410   :  { %v2479_v50 = vpop.eup %2478 }
 0x411   :  { %1679 = vadd.xlane.f32.xlu0 %v2479_v50 }
 0x49e   :  { %v1680_v51 = vpop.xlane.xlu0 %1679 }
 0x49f   :  { %2480 = vlog2.f32 %v1680_v51 }
 0x4a9   :  { %v2481_v52 = vpop.eup %2480 }
 0x4aa   :  { %v1682_v53 = vmul.f32 0.6931472, %v2481_v52 }
 0x4ac   :  { %v1684_v54 = vsub.f32 %v1676_v48, %v1682_v53 }
 0x4ae   :  { %1685 = vst [vmem:[%s3137_s6 + $0x8] sm:$0xff] %v1684_v54 }

</bundles_post_ra>
